<compile_context>
chip_gen: v7x
topology: tpu7x:2x2x1
jax: 0.10.0
libtpu: 0.0.40
codegen_flags: <defaults>
</compile_context>

<pallas_src>
import jax
import jax.numpy as jnp
from jax.experimental import pallas as pl
from jax.experimental.pallas import tpu as pltpu

_HEAD_OUT = 7      # action(4) | raise(1) | discard(2)
_HEAD_PAD = 8      # narrow sublane-aligned head width (16x less out HBM than 128-wide)


def _round_up(x, m):
    return ((x + m - 1) // m) * m


def pokernet_kernel(x_ref, w1_ref, b1_ref, w2_ref, b2_ref, wh_ref, bh_ref,
                    out_ref):
    # In-kernel bf16 cast of the streamed input (saves a wrapper-side HBM pass).
    x = x_ref[...].astype(jnp.bfloat16)
    # fc1 + ReLU  (bf16 operands -> MXU, f32 accumulation, f32 epilogue)
    h = jnp.dot(x, w1_ref[...], preferred_element_type=jnp.float32)
    h = jnp.maximum(h + b1_ref[...], 0.0)
    # fc2 + ReLU
    h = jnp.dot(h.astype(jnp.bfloat16), w2_ref[...],
                preferred_element_type=jnp.float32)
    h = jnp.maximum(h + b2_ref[...], 0.0)
    # fused heads, zero-padded to 8 output columns
    o = jnp.dot(h.astype(jnp.bfloat16), wh_ref[...],
                preferred_element_type=jnp.float32)
    out_ref[...] = (o + bh_ref[...]).astype(out_ref.dtype)


def pokernet_forward(x, kparams, *, max_tile_b=4096):
    """x: (B, input_dim) float32. Returns (action_values, raise_value, discard_values).

    kparams: output of prepare_kernel_params() (bf16 weights, hidden padded to
    a multiple of 128, head padded to 8 columns).
    """
    B, in_dim = x.shape

    # Choose tile_b so that batch padding is minimal (<= 7 rows per tile) while
    # staying a multiple of 8 sublanes; large tiles amortize the ~0.35us/step
    # pipeline overhead and give big, efficient output DMAs.
    num_tiles = -(-B // max_tile_b)                 # ceil(B / max_tile_b)
    tile_b = _round_up(-(-B // num_tiles), 8)       # ceil(B / num_tiles) -> x8
    pad_b = num_tiles * tile_b

    if pad_b != B:  # only pads a handful of rows (never a whole tile)
        x = jnp.pad(x, ((0, pad_b - B), (0, 0)))

    # Weights/biases: whole-array blocks, constant index_map -> VMEM-resident.
    const2 = lambda a: pl.BlockSpec(a.shape, lambda i: (0, 0))

    out = pl.pallas_call(
        pokernet_kernel,
        out_shape=jax.ShapeDtypeStruct((pad_b, _HEAD_PAD), jnp.float32),
        grid=(num_tiles,),
        in_specs=[
            pl.BlockSpec((tile_b, in_dim), lambda i: (i, 0)),   # x, batch-tiled
            const2(kparams["w1"]), const2(kparams["b1"]),
            const2(kparams["w2"]), const2(kparams["b2"]),
            const2(kparams["wh"]), const2(kparams["bh"]),
        ],
        out_specs=pl.BlockSpec((tile_b, _HEAD_PAD), lambda i: (i, 0)),
        compiler_params=pltpu.CompilerParams(
            dimension_semantics=("parallel",)),
    )(x, kparams["w1"], kparams["b1"], kparams["w2"], kparams["b2"],
      kparams["wh"], kparams["bh"])

    # Single contiguous slice of the narrow output, then split in registers.
    out = out[:B, :_HEAD_OUT]
    action_values = out[:, 0:4]
    raise_value = out[:, 4:5]
    discard_values = out[:, 5:7]
    return action_values, raise_value, discard_values


def pokernet_forward_auto(x, params, kparams, *, min_pallas_batch=64):
    """Dispatch: at tiny batches (e.g. online inference with B<64) the
    pallas_call/grid setup overhead dominates, so plain fused jnp is faster."""
    if x.shape[0] < min_pallas_batch:
        return pokernet_reference(x, params)
    return pokernet_forward(x, kparams)


def init_params(key, input_dim, hidden_dim=128, output_dim=4):
    """Deterministic synthetic init mirroring the PyTorch layer shapes (f32).

    Weights stored as (in, out) (already transposed vs. nn.Linear.weight).
    Head weights/biases are concatenated: action(4) | raise(1) | discard(2).
    """
    ks = jax.random.split(key, 10)
    u = lambda k, shape, bound: jax.random.uniform(
        k, shape, jnp.float32, -bound, bound)

    # PyTorch default: U(-1/sqrt(fan_in), 1/sqrt(fan_in))
    b_in = 1.0 / jnp.sqrt(jnp.float32(input_dim))
    b_h = 1.0 / jnp.sqrt(jnp.float32(hidden_dim))

    w1 = u(ks[0], (input_dim, hidden_dim), b_in)
    b1 = u(ks[1], (1, hidden_dim), b_in)
    w2 = u(ks[2], (hidden_dim, hidden_dim), b_h)
    b2 = u(ks[3], (1, hidden_dim), b_h)

    w_action = u(ks[4], (hidden_dim, output_dim), b_h)
    b_action = u(ks[5], (1, output_dim), b_h)
    w_raise = u(ks[6], (hidden_dim, 1), b_h)
    b_raise = u(ks[7], (1, 1), b_h)
    w_discard = u(ks[8], (hidden_dim, 2), b_h)
    b_discard = u(ks[9], (1, 2), b_h)

    wh = jnp.concatenate([w_action, w_raise, w_discard], axis=1)  # (hidden, 7)
    bh = jnp.concatenate([b_action, b_raise, b_discard], axis=1)  # (1, 7)

    return {"w1": w1, "b1": b1, "w2": w2, "b2": b2, "wh": wh, "bh": bh}


def prepare_kernel_params(params):
    """bf16 matmul weights, hidden dim zero-padded to a multiple of 128
    (lane-dense intermediates), head zero-padded to 8 columns; biases stay f32.

    Zero padding is exact: padded hidden units are ReLU(0 + 0) = 0 and the
    padded weight rows/columns contribute nothing downstream.
    """
    in_dim, hidden = params["w1"].shape
    hidden_pad = _round_up(hidden, 128)

    w1 = jnp.zeros((in_dim, hidden_pad), jnp.float32)
    w1 = w1.at[:, :hidden].set(params["w1"])
    b1 = jnp.zeros((1, hidden_pad), jnp.float32).at[:, :hidden].set(params["b1"])

    w2 = jnp.zeros((hidden_pad, hidden_pad), jnp.float32)
    w2 = w2.at[:hidden, :hidden].set(params["w2"])
    b2 = jnp.zeros((1, hidden_pad), jnp.float32).at[:, :hidden].set(params["b2"])

    wh = jnp.zeros((hidden_pad, _HEAD_PAD), jnp.float32)
    wh = wh.at[:hidden, :_HEAD_OUT].set(params["wh"])
    bh = jnp.zeros((1, _HEAD_PAD), jnp.float32).at[:, :_HEAD_OUT].set(params["bh"])

    return {
        "w1": w1.astype(jnp.bfloat16),
        "b1": b1,                       # f32 epilogue
        "w2": w2.astype(jnp.bfloat16),
        "b2": b2,                       # f32 epilogue
        "wh": wh.astype(jnp.bfloat16),
        "bh": bh,                       # f32 epilogue
    }


def pokernet_reference(x, params):
    """Pure-JAX f32 reference of the PyTorch forward for validation."""
    h = jnp.maximum(x @ params["w1"] + params["b1"], 0.0)
    h = jnp.maximum(h @ params["w2"] + params["b2"], 0.0)
    o = h @ params["wh"] + params["bh"]
    return o[:, 0:4], o[:, 4:5], o[:, 5:7]


if __name__ == "__main__":
    key = jax.random.PRNGKey(0)
    k_param, k_x1, k_x2 = jax.random.split(key, 3)

    input_dim = 16
    hidden_dim = 32
    output_dim = 4

    params = init_params(k_param, input_dim, hidden_dim, output_dim)
    kparams = prepare_kernel_params(params)

    def check(batch, kx):
        x = jax.random.normal(kx, (batch, input_dim), jnp.float32)
        av, rv, dv = pokernet_forward(x, kparams)
        jax.block_until_ready((av, rv, dv))
        ra, rr, rd = pokernet_reference(x, params)
        assert av.shape == (batch, output_dim)
        assert rv.shape == (batch, 1)
        assert dv.shape == (batch, 2)
        # bf16 matmul operands with f32 accumulation -> loose tolerance vs f32 ref
        assert jnp.allclose(av, ra, atol=5e-2, rtol=5e-2)
        assert jnp.allclose(rv, rr, atol=5e-2, rtol=5e-2)
        assert jnp.allclose(dv, rd, atol=5e-2, rtol=5e-2)

    # Small shape consistent with the module (batch=2), through the kernel.
    check(2, k_x1)
    # Larger batch exercising the tile-size selection / minimal padding path.
    check(1000, k_x2)

    print("KERNEL_OK")
</pallas_src>

<mosaic_0001>
module attributes {stable_mosaic.version = 11 : i64} {
  func.func @pokernet_kernel(%arg0: i32, %arg1: memref<8x16xf32, #tpu.memory_space<vmem>>, %arg2: memref<16x128xbf16, #tpu.memory_space<vmem>>, %arg3: memref<1x128xf32, #tpu.memory_space<vmem>>, %arg4: memref<128x128xbf16, #tpu.memory_space<vmem>>, %arg5: memref<1x128xf32, #tpu.memory_space<vmem>>, %arg6: memref<128x8xbf16, #tpu.memory_space<vmem>>, %arg7: memref<1x8xf32, #tpu.memory_space<vmem>>, %arg8: memref<8x8xf32, #tpu.memory_space<vmem>>) attributes {dimension_semantics = [#tpu.dimension_semantics<parallel>], iteration_bounds = array<i64: 1>, scalar_prefetch = 0 : i64, scratch_operands = 0 : i64, tpu.core_type = #tpu.core_type<tc>, window_params = [{transform_indices = @transform_0, window_bounds = array<i64: 8, 16>}, {pipeline_mode = #tpu.pipeline_mode<synchronous>, transform_indices = @transform_1, window_bounds = array<i64: 16, 128>}, {pipeline_mode = #tpu.pipeline_mode<synchronous>, transform_indices = @transform_2, window_bounds = array<i64: 1, 128>}, {pipeline_mode = #tpu.pipeline_mode<synchronous>, transform_indices = @transform_3, window_bounds = array<i64: 128, 128>}, {pipeline_mode = #tpu.pipeline_mode<synchronous>, transform_indices = @transform_4, window_bounds = array<i64: 1, 128>}, {pipeline_mode = #tpu.pipeline_mode<synchronous>, transform_indices = @transform_5, window_bounds = array<i64: 128, 8>}, {pipeline_mode = #tpu.pipeline_mode<synchronous>, transform_indices = @transform_6, window_bounds = array<i64: 1, 8>}, {transform_indices = @transform_7, window_bounds = array<i64: 8, 8>}]} {
    %c0 = arith.constant 0 : index
    %c0_0 = arith.constant 0 : index
    %0 = vector.load %arg1[%c0, %c0_0] : memref<8x16xf32, #tpu.memory_space<vmem>>, vector<8x16xf32>
    %1 = arith.truncf %0 : vector<8x16xf32> to vector<8x16xbf16>
    %c0_1 = arith.constant 0 : index
    %c0_2 = arith.constant 0 : index
    %2 = vector.load %arg2[%c0_1, %c0_2] : memref<16x128xbf16, #tpu.memory_space<vmem>>, vector<16x128xbf16>
    %cst = arith.constant dense<0.000000e+00> : vector<8x128xf32>
    %3 = tpu.matmul %1, %2, %cst {dimension_numbers = #tpu.dot_dimension_numbers<[1], [0], [0], [1], [0, 0, 1, 1], [], []>} : vector<8x16xbf16>, vector<16x128xbf16>, vector<8x128xf32> -> vector<8x128xf32>
    %c0_3 = arith.constant 0 : index
    %c0_4 = arith.constant 0 : index
    %4 = vector.load %arg3[%c0_3, %c0_4] : memref<1x128xf32, #tpu.memory_space<vmem>>, vector<1x128xf32>
    %5 = vector.broadcast %4 : vector<1x128xf32> to vector<8x128xf32>
    %6 = arith.addf %3, %5 : vector<8x128xf32>
    %cst_5 = arith.constant 0.000000e+00 : f32
    %7 = vector.broadcast %cst_5 : f32 to vector<8x128xf32>
    %8 = arith.maximumf %6, %7 : vector<8x128xf32>
    %9 = arith.truncf %8 : vector<8x128xf32> to vector<8x128xbf16>
    %c0_6 = arith.constant 0 : index
    %c0_7 = arith.constant 0 : index
    %10 = vector.load %arg4[%c0_6, %c0_7] : memref<128x128xbf16, #tpu.memory_space<vmem>>, vector<128x128xbf16>
    %cst_8 = arith.constant dense<0.000000e+00> : vector<8x128xf32>
    %11 = tpu.matmul %9, %10, %cst_8 {dimension_numbers = #tpu.dot_dimension_numbers<[1], [0], [0], [1], [0, 0, 1, 1], [], []>} : vector<8x128xbf16>, vector<128x128xbf16>, vector<8x128xf32> -> vector<8x128xf32>
    %c0_9 = arith.constant 0 : index
    %c0_10 = arith.constant 0 : index
    %12 = vector.load %arg5[%c0_9, %c0_10] : memref<1x128xf32, #tpu.memory_space<vmem>>, vector<1x128xf32>
    %13 = vector.broadcast %12 : vector<1x128xf32> to vector<8x128xf32>
    %14 = arith.addf %11, %13 : vector<8x128xf32>
    %cst_11 = arith.constant 0.000000e+00 : f32
    %15 = vector.broadcast %cst_11 : f32 to vector<8x128xf32>
    %16 = arith.maximumf %14, %15 : vector<8x128xf32>
    %17 = arith.truncf %16 : vector<8x128xf32> to vector<8x128xbf16>
    %c0_12 = arith.constant 0 : index
    %c0_13 = arith.constant 0 : index
    %18 = vector.load %arg6[%c0_12, %c0_13] : memref<128x8xbf16, #tpu.memory_space<vmem>>, vector<128x8xbf16>
    %cst_14 = arith.constant dense<0.000000e+00> : vector<8x8xf32>
    %19 = tpu.matmul %17, %18, %cst_14 {dimension_numbers = #tpu.dot_dimension_numbers<[1], [0], [0], [1], [0, 0, 1, 1], [], []>} : vector<8x128xbf16>, vector<128x8xbf16>, vector<8x8xf32> -> vector<8x8xf32>
    %c0_15 = arith.constant 0 : index
    %c0_16 = arith.constant 0 : index
    %20 = vector.load %arg7[%c0_15, %c0_16] : memref<1x8xf32, #tpu.memory_space<vmem>>, vector<1x8xf32>
    %21 = vector.broadcast %20 : vector<1x8xf32> to vector<8x8xf32>
    %22 = arith.addf %19, %21 : vector<8x8xf32>
    %c0_17 = arith.constant 0 : index
    %c0_18 = arith.constant 0 : index
    %23 = vector.load %arg8[%c0_17, %c0_18] : memref<8x8xf32, #tpu.memory_space<vmem>>, vector<8x8xf32>
    tpu.vector_store %arg8[%c0_17, %c0_18], %22 {strides = array<i32>} : memref<8x8xf32, #tpu.memory_space<vmem>>, vector<8x8xf32>,
    return
  }
  func.func @transform_0(%arg0: i32) -> (i32, i32) {
    %c0_i32 = arith.constant 0 : i32
    %c0_i32_0 = arith.constant 0 : i32
    return %arg0, %c0_i32 : i32, i32
  }
  func.func @transform_1(%arg0: i32) -> (i32, i32) {
    %c0_i32 = arith.constant 0 : i32
    %c0_i32_0 = arith.constant 0 : i32
    %c0_i32_1 = arith.constant 0 : i32
    return %c0_i32, %c0_i32_0 : i32, i32
  }
  func.func @transform_2(%arg0: i32) -> (i32, i32) {
    %c0_i32 = arith.constant 0 : i32
    %c0_i32_0 = arith.constant 0 : i32
    %c0_i32_1 = arith.constant 0 : i32
    return %c0_i32, %c0_i32_0 : i32, i32
  }
  func.func @transform_3(%arg0: i32) -> (i32, i32) {
    %c0_i32 = arith.constant 0 : i32
    %c0_i32_0 = arith.constant 0 : i32
    %c0_i32_1 = arith.constant 0 : i32
    return %c0_i32, %c0_i32_0 : i32, i32
  }
  func.func @transform_4(%arg0: i32) -> (i32, i32) {
    %c0_i32 = arith.constant 0 : i32
    %c0_i32_0 = arith.constant 0 : i32
    %c0_i32_1 = arith.constant 0 : i32
    return %c0_i32, %c0_i32_0 : i32, i32
  }
  func.func @transform_5(%arg0: i32) -> (i32, i32) {
    %c0_i32 = arith.constant 0 : i32
    %c0_i32_0 = arith.constant 0 : i32
    %c0_i32_1 = arith.constant 0 : i32
    return %c0_i32, %c0_i32_0 : i32, i32
  }
  func.func @transform_6(%arg0: i32) -> (i32, i32) {
    %c0_i32 = arith.constant 0 : i32
    %c0_i32_0 = arith.constant 0 : i32
    %c0_i32_1 = arith.constant 0 : i32
    return %c0_i32, %c0_i32_0 : i32, i32
  }
  func.func @transform_7(%arg0: i32) -> (i32, i32) {
    %c0_i32 = arith.constant 0 : i32
    %c0_i32_0 = arith.constant 0 : i32
    return %arg0, %c0_i32 : i32, i32
  }
}

</mosaic_0001>

<bundles_post_ra>
// kernel: tpu_custom_call.1
= control target key start
LH: loop header
LB: loop body
LE: loop exit
PB: predicated region body
PF: predicated region fallthrough
CT: control target
= control target key end

     0   :  { %12 = vsyncpa [#allocation3], 0  ;;  %s654_s0 = inlined_call_operand.vmem [shape: f32[8,16], index: 0, kind: input, shape index: {}]   ;;  %s655_s1 = inlined_call_operand.hbm [shape: bf16[16,128], index: 1, kind: input, shape index: {}]   ;;  %s656_s2 = inlined_call_operand.vmem [shape: f32[1,128], index: 2, kind: input, shape index: {}]   ;;  %s657_s3 = inlined_call_operand.vmem [shape: bf16[128,128], index: 3, kind: input, shape index: {}]   ;;  %s658_s4 = inlined_call_operand.vmem [shape: f32[1,128], index: 4, kind: input, shape index: {}]   ;;  %s659_s5 = inlined_call_operand.vmem [shape: bf16[128,8], index: 5, kind: input, shape index: {}]   ;;  %s660_s6 = inlined_call_operand.vmem [shape: f32[1,8], index: 6, kind: input, shape index: {}]   ;;  %s661_s7 = inlined_call_operand.hbm [shape: f32[8,8], index: 7, kind: output, shape index: {}]  }
   0x1   :  { %13 = vsyncpa [#allocation4], 0  ;;  %s504_s24 = smov [#allocation2]   ;;  %s456_s28 = scalar_lea.hbm %s655_s1, 128 }
   0x2   :  { %s21_s25 = sshll.u32 %s504_s24, 4  ;;  %p457_p0 = scmp.ne.s32.totalorder %s655_s1, %s456_s28  ;;  %s22_s25 = int_to_ptr.vmem [resolvable:$true] %s21_s25 }
   0x3   :  { %p460_p1 = scmp.lt.u32.totalorder %s456_s28, %s655_s1 }
   0x5   :  { %p462_p2 = pnand %p460_p1, %p457_p0 }
   0x7   :  { %465 = shalt.err (!%p462_p2)
}
   0x8   :  { %s466_s10 = scalar_lea.vmem %s22_s25, 128  ;;  %p471_p4 = scmp.lt.s32.totalorder %s22_s25, %s22_s25 }
   0x9   :  { %p467_p3 = scmp.ne.s32.totalorder %s22_s25, %s466_s10  ;;  %p472_p5 = scmp.lt.s32.totalorder %s466_s10, %s466_s10 }
   0xb   :  { %p473_p6 = por %p472_p5, %p471_p4 }
   0xd   :  { %p474_p7 = pnand %p473_p6, %p467_p3 }
   0xf   :  { %477 = shalt.err (!%p474_p7)
}
  0x10   :  { %s505_s11 = smov 64   ;;  %s506_s12 = smov 4  }
  0x11   :  { %27 = dma.hbm_to_vmem [thread:$0]  %s655_s1, 128, %s22_s25, [#allocation3], %s505_s11, %s505_s11, %s506_s12  }
  0x12   :  { %500 = dma.done.wait [#allocation3], 128  }
  0x13   :  { %501 = vsyncadd [#allocation3], 4294967168  ;;  %v507_v0 = vmov 0.0   ;;  %vm508_vm0 = vmmov 0   ;;  %v439_v1 = vld [vmem:[#allocation2] sm:$0xff]   ;;  %vm59_vm1 = vcmask 130048  }
  0x14   :  { %387 = vmatprep.subr.bf16.mxu0 %v507_v0  ;;  %389 = vmatprep.mubr.msk.bf16.mxu0 %vm508_vm0, %v507_v0  ;;  %v42_v2 = vld [vmem:[%s654_s0] sm:$0xff]  ;;  %v441_v5 = vld [vmem:[%s657_s3 + $0x8] sm:$0xff]   ;;  %v442_v6 = vld [vmem:[%s657_s3 + $0x10] sm:$0xff]   ;;  %s509_s26 = smov [#allocation5]   ;;  %vm329_vm2 = vcmask 64512  }
  0x15   :  { %393 = vmatprep.subr.bf16.mxu1 %v507_v0  ;;  %409 = vmatprep.mubr.msk.bf16.mxu1 %vm508_vm0, %v507_v0  ;;  %v43_v3 = vpack.c.bf16 %v42_v2, %v42_v2  ;;  %v440_v4 = vld [vmem:[%s657_s3] sm:$0xff]   ;;  %v443_v7 = vld [vmem:[%s657_s3 + $0x18] sm:$0xff]   ;;  %v445_v9 = vld [vmem:[%s657_s3 + $0x28] sm:$0xff]   ;;  %s337_s27 = sshll.u32 %s509_s26, 4  ;;  %s338_s27 = int_to_ptr.vmem [resolvable:$true] %s337_s27 }
  0x16   :  { %388 = vmatpush3.bf16.msra.mxu0 %v439_v1  ;;  %394 = vmatpush3.bf16.msra.mxu1 %v440_v4  ;;  %v444_v8 = vld [vmem:[%s657_s3 + $0x20] sm:$0xff]   ;;  %v446_v10 = vld [vmem:[%s657_s3 + $0x30] sm:$0xff]   ;;  %v447_v11 = vld [vmem:[%s657_s3 + $0x38] sm:$0xff]   ;;  %p483_p9 = scmp.lt.s32.totalorder %s338_s27, %s338_s27 }
  0x17   :  { %413 = vmatprep.subr.bf16.mxu0 %v507_v0  ;;  %395 = vmatprep.subr.bf16.mxu1 %v507_v0  ;;  %v448_v12 = vld [vmem:[%s659_s5] sm:$0xff]   ;;  %v449_v13 = vld [vmem:[%s659_s5 + $0x8] sm:$0xff]   ;;  %v450_v14 = vld [vmem:[%s659_s5 + $0x10] sm:$0xff]  }
  0x18   :  { %v451_v15 = vld [vmem:[%s659_s5 + $0x18] sm:$0xff]   ;;  %v452_v16 = vld [vmem:[%s659_s5 + $0x20] sm:$0xff]   ;;  %v453_v17 = vld [vmem:[%s659_s5 + $0x28] sm:$0xff]  }
  0x19   :  { %390 = vmatmul.mubr.msk.bf16.vlgmr.msra.gmra.mrb[0].mxu0 %vm59_vm1, %v43_v3  ;;  %v346_v18 = vld [vmem:[%s656_s2] ss:$0 sm:$0xff]  ;;  %v454_v26 = vld [vmem:[%s659_s5 + $0x30] sm:$0xff]   ;;  %v455_v27 = vld [vmem:[%s659_s5 + $0x38] sm:$0xff]  }
  0x1a   :  { %429 = vmatprep.mubr.msk.bf16.mxu0 %vm508_vm0, %v507_v0  ;;  %396 = vmatpush3.bf16.msra.mxu1 %v441_v5  ;;  %v349_v28 = vld [vmem:[%s658_s4] ss:$0 sm:$0xff]  ;;  %s478_s4 = scalar_lea.vmem %s338_s27, 128 }
  0x1b   :  { %397 = vmatprep.subr.bf16.mxu1 %v507_v0  ;;  %414 = vmatpush3.bf16.msra.mxu0 %v448_v12  ;;  %v358_v36 = vld [vmem:[%s660_s6] ss:$0 sm:$0xff]  ;;  %p479_p8 = scmp.ne.s32.totalorder %s338_s27, %s478_s4  ;;  %p484_p10 = scmp.lt.s32.totalorder %s478_s4, %s478_s4 }
  0x1c   :  { %415 = vmatprep.subr.bf16.mxu0 %v507_v0 }
  0x1d   :  { %p485_p11 = por %p484_p10, %p483_p9 }
  0x1e   :  { %398 = vmatpush3.bf16.msra.mxu1 %v442_v6 }
  0x1f   :  { %399 = vmatprep.subr.bf16.mxu1 %v507_v0  ;;  %416 = vmatpush3.bf16.msra.mxu0 %v449_v13  ;;  %p486_p12 = pnand %p485_p11, %p479_p8 }
  0x20   :  { %417 = vmatprep.subr.bf16.mxu0 %v507_v0 }
  0x22   :  { %400 = vmatpush3.bf16.msra.mxu1 %v443_v7 }
  0x23   :  { %401 = vmatprep.subr.bf16.mxu1 %v507_v0  ;;  %418 = vmatpush3.bf16.msra.mxu0 %v450_v14 }
  0x24   :  { %419 = vmatprep.subr.bf16.mxu0 %v507_v0 }
  0x26   :  { %402 = vmatpush3.bf16.msra.mxu1 %v444_v8 }
  0x27   :  { %403 = vmatprep.subr.bf16.mxu1 %v507_v0  ;;  %420 = vmatpush3.bf16.msra.mxu0 %v451_v15 }
  0x28   :  { %421 = vmatprep.subr.bf16.mxu0 %v507_v0 }
  0x2a   :  { %404 = vmatpush3.bf16.msra.mxu1 %v445_v9 }
  0x2b   :  { %405 = vmatprep.subr.bf16.mxu1 %v507_v0  ;;  %422 = vmatpush3.bf16.msra.mxu0 %v452_v16 }
  0x2c   :  { %423 = vmatprep.subr.bf16.mxu0 %v507_v0 }
  0x2e   :  { %406 = vmatpush3.bf16.msra.mxu1 %v446_v10 }
  0x2f   :  { %407 = vmatprep.subr.bf16.mxu1 %v507_v0  ;;  %424 = vmatpush3.bf16.msra.mxu0 %v453_v17 }
  0x30   :  { %425 = vmatprep.subr.bf16.mxu0 %v507_v0 }
  0x32   :  { %408 = vmatpush3.bf16.msra.mxu1 %v447_v11 }
  0x33   :  { %426 = vmatpush3.bf16.msra.mxu0 %v454_v26 }
  0x34   :  { %427 = vmatprep.subr.bf16.mxu0 %v507_v0 }
  0x37   :  { %428 = vmatpush3.bf16.msra.mxu0 %v455_v27 }
  0xec   :  { %v97_v19 = vpop.f32.mrb[0].mxu0 }
  0xed   :  { %v98_v20 = vadd.f32 %v346_v18, %v97_v19  ;;  %v391_v21 = vpop.f32.mrb[1].mxu0 }
  0xee   :  { %v100_v22 = vpop.f32.mrb[2].mxu0 }
  0xef   :  { %v103_v23 = vmax.f32 %v98_v20, 0.0  ;;  %v392_v24 = vpop.f32.mrb[3].mxu0 }
  0xf1   :  { %v104_v25 = vpack.c.bf16 %v103_v23, %v103_v23 }
  0xf3   :  { %410 = vmatmul.mubr.bf16.vlgmr.msra.gmra.mrb[0].mxu1 %v104_v25 }
 0x1c6   :  { %v210_v29 = vpop.f32.mrb[0].mxu1 }
 0x1c7   :  { %v211_v30 = vadd.f32 %v349_v28, %v210_v29  ;;  %v411_v31 = vpop.f32.mrb[1].mxu1 }
 0x1c8   :  { %v213_v32 = vpop.f32.mrb[2].mxu1 }
 0x1c9   :  { %v216_v33 = vmax.f32 %v211_v30, 0.0  ;;  %v412_v34 = vpop.f32.mrb[3].mxu1 }
 0x1cb   :  { %v217_v35 = vpack.c.bf16 %v216_v33, %v216_v33 }
 0x1cd   :  { %430 = vmatmul.mubr.bf16.vlgmr.msra.gmra.mrb[4].mxu0 %v217_v35 }
 0x2a0   :  { %v323_v37 = vpop.f32.mrb[4].mxu0 }
 0x2a1   :  { %v324_v38 = vadd.f32 %v358_v36, %v323_v37  ;;  %v431_v39 = vpop.f32.mrb[5].mxu0 }
 0x2a2   :  { %v326_v40 = vpop.f32.mrb[6].mxu0 }
 0x2a3   :  { %v432_v41 = vpop.f32.mrb[7].mxu0  ;;  %330 = vst.msk [vmem:[#allocation5] sm:$0xff] %vm329_vm2, %v324_v38 }
 0x2a4   :  { %489 = shalt.err (!%p486_p12)
}
 0x2a5   :  { %s490_s6 = scalar_lea.hbm %s661_s7, 128 }
 0x2a6   :  { %p491_p13 = scmp.ne.s32.totalorder %s661_s7, %s490_s6  ;;  %p494_p0 = scmp.lt.u32.totalorder %s490_s6, %s661_s7 }
 0x2a8   :  { %p496_p1 = pnand %p494_p0, %p491_p13 }
 0x2aa   :  { %499 = shalt.err (!%p496_p1)
}
 0x2ab   :  { %340 = dma.vmem_to_hbm [thread:$0]  %s338_s27, 128, %s661_s7, [#allocation4]  }
 0x2ac   :  { %502 = dma.done.wait [#allocation4], 128  }
 0x2ad   :  { %503 = vsyncadd [#allocation4], 4294967168 }
 0x2ae   :  { %344 = vsyncpa [#allocation3], 1 }
 0x2af   :  { %345 = vsyncpa [#allocation4], 1 }

</bundles_post_ra>
